<compile_context>
chip_gen: v5e
topology: v5e:2x2
jax: 0.10.0
libtpu: 0.0.40
codegen_flags: <defaults>
</compile_context>

<pallas_src>
import jax
import jax.numpy as jnp
from jax.experimental import pallas as pl
from jax.experimental.pallas import tpu as pltpu


def _round_up(v, m):
    return ((v + m - 1) // m) * m


def _cdiv(a, b):
    return -(-a // b)


def _make_vpu_kernel(cin, cout):
    """1x1 conv as scalar(SMEM) x vector MACs + single full-block concat store."""

    def kernel(x_ref, integ_ref, w_ref, b_ref, out_ref):
        odt = out_ref.dtype
        integ = integ_ref[...]                      # (Cin, T), native dtype
        rows = []
        for o in range(cout):
            # Bias folded into the first MAC; w/b scalars ride the scalar
            # slots from SMEM.  Accumulation in f32 matches the PyTorch conv.
            # (For bf16 inputs the multiply promotes to f32; on v6e/v7x a
            # bf16-multiply variant would be possible but this kernel is
            # HBM-bound, so the VALU chain is hidden under the DMAs anyway.)
            acc = b_ref[o] + w_ref[o, 0] * integ[0:1, :].astype(jnp.float32)
            for c in range(1, cin):
                acc = acc + w_ref[o, c] * integ[c:c + 1, :].astype(jnp.float32)
            rows.append(acc.astype(odt))            # (1, T)
        # One aligned full-block store: [x ; conv] along the channel axis.
        out_ref[...] = jnp.concatenate([x_ref[...]] + rows, axis=0)

    return kernel


def _mxu_kernel(x_ref, integ_ref, w_ref, b_ref, out_ref):
    """(Cout, Cin) @ (Cin, T) on the MXU — only for large channel counts."""
    conv = jnp.dot(w_ref[...], integ_ref[...],
                   preferred_element_type=jnp.float32)
    conv = conv + b_ref[...]                        # (Cout, 1) f32 bias
    out_ref[...] = jnp.concatenate(
        [x_ref[...], conv.astype(out_ref.dtype)], axis=0)


def integrator_forward(x, integrated, weight, bias, *, target_tile_hw=65536):
    """Pallas port of Integrator.forward.

    x: (N, C_x, H, W), integrated: (N, C_in, H, W),
    weight: (C_out, C_in, 1, 1), bias: (C_out,) -> (N, C_x + C_out, H, W)
    """
    N, Cx, H, W = x.shape
    Cin = integrated.shape[1]
    Cout = weight.shape[0]
    HW = H * W
    dtype = x.dtype
    itemsize = jnp.dtype(dtype).itemsize

    # Channel-major views: free reshapes.
    x3 = x.reshape(N, Cx, HW)
    integ3 = integrated.reshape(N, Cin, HW)
    w2 = weight.reshape(Cout, Cin)

    # MXU only pays off when the contraction is long enough that the VPU MAC
    # chain could stop hiding under the DMAs AND Cout fills a useful fraction
    # of the MXU rows.  Typical Integrator shapes (tiny Cin/Cout) -> VPU.
    use_mxu = (Cout >= 16) and (Cin * _cdiv(Cout, 8) >= 64)

    # ---- pixel-tile selection (lane axis, multiple of 128 or full HW) ------
    IN_DEPTH, OUT_DEPTH = 3, 2            # Buffered(3) inputs, default output
    sub = 8 * (4 // itemsize)             # sublane padding granularity (f32:8, bf16:16)

    def pad_rows(c):
        return _round_up(max(c, 1), sub)

    # Real VMEM bytes per pixel, including sublane padding and buffer depth.
    bytes_per_pixel = itemsize * (
        IN_DEPTH * (pad_rows(Cx) + pad_rows(Cin))
        + OUT_DEPTH * pad_rows(Cx + Cout))
    vmem_budget = 32 * 1024 * 1024        # target footprint (fits every gen)
    cap = max(128, (vmem_budget // bytes_per_pixel) // 128 * 128)
    target = min(target_tile_hw, cap)

    if HW <= 128:
        tile_hw = HW                      # full-extent lane block (always legal)
    else:
        tile_hw = min(_round_up(target, 128), _round_up(HW, 128))
        # Keep >= 4 parallel grid steps when possible so v7x's two
        # TensorCores both get work (harmless on single-TC v5e/v6e).
        while N * _cdiv(HW, tile_hw) < 4 and tile_hw > 128:
            tile_hw = max(128, _round_up(tile_hw // 2, 128))

    grid = (N, _cdiv(HW, tile_hw))        # ragged last tile is masked by Pallas

    if use_mxu:
        kernel = _mxu_kernel
        w_arg = w2
        b_arg = bias.reshape(Cout, 1).astype(jnp.float32)
        w_spec = pl.BlockSpec((Cout, Cin), lambda n, t: (0, 0))
        b_spec = pl.BlockSpec((Cout, 1), lambda n, t: (0, 0))
    else:
        kernel = _make_vpu_kernel(Cin, Cout)
        # Weights/bias as 32-bit scalars in SMEM: no per-step VMEM DMAs, no
        # broadcast setup; scalar reads ride the free scalar slots.
        w_arg = w2.astype(jnp.float32)
        b_arg = bias.reshape(Cout).astype(jnp.float32)
        w_spec = pl.BlockSpec(memory_space=pltpu.MemorySpace.SMEM)
        b_spec = pl.BlockSpec(memory_space=pltpu.MemorySpace.SMEM)

    cost = pl.CostEstimate(
        flops=2 * N * HW * Cin * Cout,
        transcendentals=0,
        bytes_accessed=N * HW * (2 * Cx + Cin + Cout) * itemsize,
    )

    out_spec = pl.BlockSpec((None, Cx + Cout, tile_hw), lambda n, t: (n, 0, t))

    def build_in_specs(deep):
        kw = dict(pipeline_mode=pl.Buffered(IN_DEPTH)) if deep else {}
        x_spec = pl.BlockSpec((None, Cx, tile_hw), lambda n, t: (n, 0, t), **kw)
        i_spec = pl.BlockSpec((None, Cin, tile_hw), lambda n, t: (n, 0, t), **kw)
        return [x_spec, i_spec, w_spec, b_spec]

    def run(deep):
        return pl.pallas_call(
            kernel,
            out_shape=jax.ShapeDtypeStruct((N, Cx + Cout, HW), dtype),
            grid_spec=pltpu.PrefetchScalarGridSpec(
                num_scalar_prefetch=0,
                grid=grid,
                in_specs=build_in_specs(deep),
                out_specs=out_spec,
            ),
            compiler_params=pltpu.CompilerParams(
                dimension_semantics=("parallel", "parallel"),
                # Above v5e's 16 MiB default, well under v7x's 64 MiB physical;
                # actual footprint stays <= ~vmem_budget via the tile cap.
                vmem_limit_bytes=40 * 1024 * 1024,
            ),
            cost_estimate=cost,
        )(x3, integ3, w_arg, b_arg)

    try:
        out3 = run(True)      # 3-deep input pipelining (biggest win on v7x)
    except Exception:         # pipeline_mode unsupported -> default 2-deep
        out3 = run(False)

    return out3.reshape(N, Cx + Cout, H, W)


if __name__ == "__main__":
    # Small shapes consistent with the forward pass.
    N, Cx, Cin, Cout, H, W = 2, 4, 4, 6, 16, 16

    key = jax.random.PRNGKey(0)
    kx, ki, kw, kb = jax.random.split(key, 4)

    x = jax.random.normal(kx, (N, Cx, H, W), dtype=jnp.float32)
    integrated = jax.random.normal(ki, (N, Cin, H, W), dtype=jnp.float32)

    # Deterministic synthetic parameters (shapes from Conv2d(C_in, C_out, 1)).
    weight = jax.random.normal(kw, (Cout, Cin, 1, 1), dtype=jnp.float32) * 0.1
    bias = jax.random.normal(kb, (Cout,), dtype=jnp.float32) * 0.1

    out = integrator_forward(x, integrated, weight, bias)
    out = jax.block_until_ready(out)

    # Pure-JAX reference for the same semantics.
    conv_ref = jnp.einsum("nchw,oc->nohw", integrated,
                          weight.reshape(Cout, Cin)) \
        + bias.reshape(1, Cout, 1, 1)
    ref = jnp.concatenate([x, conv_ref], axis=1)

    assert out.shape == (N, Cx + Cout, H, W)
    assert jnp.allclose(out, ref, atol=1e-5, rtol=1e-5)
    print("KERNEL_OK")
</pallas_src>

<mosaic_0001>
module attributes {stable_mosaic.version = 11 : i64} {
  func.func @kernel(%arg0: i32, %arg1: i32, %arg2: memref<1x4x128xf32, #tpu.memory_space<vmem>>, %arg3: memref<1x4x128xf32, #tpu.memory_space<vmem>>, %arg4: memref<6x4xf32, #tpu.memory_space<smem>>, %arg5: memref<6xf32, #tpu.memory_space<smem>>, %arg6: memref<1x10x128xf32, #tpu.memory_space<vmem>>) attributes {dimension_semantics = [#tpu.dimension_semantics<parallel>, #tpu.dimension_semantics<parallel>], iteration_bounds = array<i64: 2, 2>, scalar_prefetch = 0 : i64, scratch_operands = 0 : i64, tpu.core_type = #tpu.core_type<tc>, window_params = [{transform_indices = @transform_0, window_bounds = array<i64: 1, 4, 128>}, {transform_indices = @transform_1, window_bounds = array<i64: 1, 4, 128>}, {transform_indices = @transform_2, window_bounds = array<i64: 6, 4>}, {transform_indices = @transform_3, window_bounds = array<i64: 6>}, {transform_indices = @transform_4, window_bounds = array<i64: 1, 10, 128>}]} {
    %c0 = arith.constant 0 : index
    %c0_0 = arith.constant 0 : index
    %c0_1 = arith.constant 0 : index
    %0 = vector.load %arg3[%c0, %c0_0, %c0_1] : memref<1x4x128xf32, #tpu.memory_space<vmem>>, vector<1x4x128xf32>
    %1 = vector.shape_cast %0 : vector<1x4x128xf32> to vector<4x128xf32>
    %c0_2 = arith.constant 0 : index
    %2 = memref.load %arg5[%c0_2] : memref<6xf32, #tpu.memory_space<smem>>
    %c0_3 = arith.constant 0 : index
    %c0_4 = arith.constant 0 : index
    %3 = memref.load %arg4[%c0_3, %c0_4] : memref<6x4xf32, #tpu.memory_space<smem>>
    %4 = vector.extract_strided_slice %1 {offsets = [0, 0], sizes = [1, 128], strides = [1, 1]} : vector<4x128xf32> to vector<1x128xf32>
    %5 = vector.broadcast %3 : f32 to vector<1x128xf32>
    %6 = arith.mulf %5, %4 : vector<1x128xf32>
    %7 = vector.broadcast %2 : f32 to vector<1x128xf32>
    %8 = arith.addf %7, %6 : vector<1x128xf32>
    %c0_5 = arith.constant 0 : index
    %c1 = arith.constant 1 : index
    %9 = memref.load %arg4[%c0_5, %c1] : memref<6x4xf32, #tpu.memory_space<smem>>
    %10 = vector.extract_strided_slice %1 {offsets = [1, 0], sizes = [1, 128], strides = [1, 1]} : vector<4x128xf32> to vector<1x128xf32>
    %11 = vector.broadcast %9 : f32 to vector<1x128xf32>
    %12 = arith.mulf %11, %10 : vector<1x128xf32>
    %13 = arith.addf %8, %12 : vector<1x128xf32>
    %c0_6 = arith.constant 0 : index
    %c2 = arith.constant 2 : index
    %14 = memref.load %arg4[%c0_6, %c2] : memref<6x4xf32, #tpu.memory_space<smem>>
    %15 = vector.extract_strided_slice %1 {offsets = [2, 0], sizes = [1, 128], strides = [1, 1]} : vector<4x128xf32> to vector<1x128xf32>
    %16 = vector.broadcast %14 : f32 to vector<1x128xf32>
    %17 = arith.mulf %16, %15 : vector<1x128xf32>
    %18 = arith.addf %13, %17 : vector<1x128xf32>
    %c0_7 = arith.constant 0 : index
    %c3 = arith.constant 3 : index
    %19 = memref.load %arg4[%c0_7, %c3] : memref<6x4xf32, #tpu.memory_space<smem>>
    %20 = vector.extract_strided_slice %1 {offsets = [3, 0], sizes = [1, 128], strides = [1, 1]} : vector<4x128xf32> to vector<1x128xf32>
    %21 = vector.broadcast %19 : f32 to vector<1x128xf32>
    %22 = arith.mulf %21, %20 : vector<1x128xf32>
    %23 = arith.addf %18, %22 : vector<1x128xf32>
    %c1_8 = arith.constant 1 : index
    %24 = memref.load %arg5[%c1_8] : memref<6xf32, #tpu.memory_space<smem>>
    %c1_9 = arith.constant 1 : index
    %c0_10 = arith.constant 0 : index
    %25 = memref.load %arg4[%c1_9, %c0_10] : memref<6x4xf32, #tpu.memory_space<smem>>
    %26 = vector.extract_strided_slice %1 {offsets = [0, 0], sizes = [1, 128], strides = [1, 1]} : vector<4x128xf32> to vector<1x128xf32>
    %27 = vector.broadcast %25 : f32 to vector<1x128xf32>
    %28 = arith.mulf %27, %26 : vector<1x128xf32>
    %29 = vector.broadcast %24 : f32 to vector<1x128xf32>
    %30 = arith.addf %29, %28 : vector<1x128xf32>
    %c1_11 = arith.constant 1 : index
    %c1_12 = arith.constant 1 : index
    %31 = memref.load %arg4[%c1_11, %c1_12] : memref<6x4xf32, #tpu.memory_space<smem>>
    %32 = vector.extract_strided_slice %1 {offsets = [1, 0], sizes = [1, 128], strides = [1, 1]} : vector<4x128xf32> to vector<1x128xf32>
    %33 = vector.broadcast %31 : f32 to vector<1x128xf32>
    %34 = arith.mulf %33, %32 : vector<1x128xf32>
    %35 = arith.addf %30, %34 : vector<1x128xf32>
    %c1_13 = arith.constant 1 : index
    %c2_14 = arith.constant 2 : index
    %36 = memref.load %arg4[%c1_13, %c2_14] : memref<6x4xf32, #tpu.memory_space<smem>>
    %37 = vector.extract_strided_slice %1 {offsets = [2, 0], sizes = [1, 128], strides = [1, 1]} : vector<4x128xf32> to vector<1x128xf32>
    %38 = vector.broadcast %36 : f32 to vector<1x128xf32>
    %39 = arith.mulf %38, %37 : vector<1x128xf32>
    %40 = arith.addf %35, %39 : vector<1x128xf32>
    %c1_15 = arith.constant 1 : index
    %c3_16 = arith.constant 3 : index
    %41 = memref.load %arg4[%c1_15, %c3_16] : memref<6x4xf32, #tpu.memory_space<smem>>
    %42 = vector.extract_strided_slice %1 {offsets = [3, 0], sizes = [1, 128], strides = [1, 1]} : vector<4x128xf32> to vector<1x128xf32>
    %43 = vector.broadcast %41 : f32 to vector<1x128xf32>
    %44 = arith.mulf %43, %42 : vector<1x128xf32>
    %45 = arith.addf %40, %44 : vector<1x128xf32>
    %c2_17 = arith.constant 2 : index
    %46 = memref.load %arg5[%c2_17] : memref<6xf32, #tpu.memory_space<smem>>
    %c2_18 = arith.constant 2 : index
    %c0_19 = arith.constant 0 : index
    %47 = memref.load %arg4[%c2_18, %c0_19] : memref<6x4xf32, #tpu.memory_space<smem>>
    %48 = vector.extract_strided_slice %1 {offsets = [0, 0], sizes = [1, 128], strides = [1, 1]} : vector<4x128xf32> to vector<1x128xf32>
    %49 = vector.broadcast %47 : f32 to vector<1x128xf32>
    %50 = arith.mulf %49, %48 : vector<1x128xf32>
    %51 = vector.broadcast %46 : f32 to vector<1x128xf32>
    %52 = arith.addf %51, %50 : vector<1x128xf32>
    %c2_20 = arith.constant 2 : index
    %c1_21 = arith.constant 1 : index
    %53 = memref.load %arg4[%c2_20, %c1_21] : memref<6x4xf32, #tpu.memory_space<smem>>
    %54 = vector.extract_strided_slice %1 {offsets = [1, 0], sizes = [1, 128], strides = [1, 1]} : vector<4x128xf32> to vector<1x128xf32>
    %55 = vector.broadcast %53 : f32 to vector<1x128xf32>
    %56 = arith.mulf %55, %54 : vector<1x128xf32>
    %57 = arith.addf %52, %56 : vector<1x128xf32>
    %c2_22 = arith.constant 2 : index
    %c2_23 = arith.constant 2 : index
    %58 = memref.load %arg4[%c2_22, %c2_23] : memref<6x4xf32, #tpu.memory_space<smem>>
    %59 = vector.extract_strided_slice %1 {offsets = [2, 0], sizes = [1, 128], strides = [1, 1]} : vector<4x128xf32> to vector<1x128xf32>
    %60 = vector.broadcast %58 : f32 to vector<1x128xf32>
    %61 = arith.mulf %60, %59 : vector<1x128xf32>
    %62 = arith.addf %57, %61 : vector<1x128xf32>
    %c2_24 = arith.constant 2 : index
    %c3_25 = arith.constant 3 : index
    %63 = memref.load %arg4[%c2_24, %c3_25] : memref<6x4xf32, #tpu.memory_space<smem>>
    %64 = vector.extract_strided_slice %1 {offsets = [3, 0], sizes = [1, 128], strides = [1, 1]} : vector<4x128xf32> to vector<1x128xf32>
    %65 = vector.broadcast %63 : f32 to vector<1x128xf32>
    %66 = arith.mulf %65, %64 : vector<1x128xf32>
    %67 = arith.addf %62, %66 : vector<1x128xf32>
    %c3_26 = arith.constant 3 : index
    %68 = memref.load %arg5[%c3_26] : memref<6xf32, #tpu.memory_space<smem>>
    %c3_27 = arith.constant 3 : index
    %c0_28 = arith.constant 0 : index
    %69 = memref.load %arg4[%c3_27, %c0_28] : memref<6x4xf32, #tpu.memory_space<smem>>
    %70 = vector.extract_strided_slice %1 {offsets = [0, 0], sizes = [1, 128], strides = [1, 1]} : vector<4x128xf32> to vector<1x128xf32>
    %71 = vector.broadcast %69 : f32 to vector<1x128xf32>
    %72 = arith.mulf %71, %70 : vector<1x128xf32>
    %73 = vector.broadcast %68 : f32 to vector<1x128xf32>
    %74 = arith.addf %73, %72 : vector<1x128xf32>
    %c3_29 = arith.constant 3 : index
    %c1_30 = arith.constant 1 : index
    %75 = memref.load %arg4[%c3_29, %c1_30] : memref<6x4xf32, #tpu.memory_space<smem>>
    %76 = vector.extract_strided_slice %1 {offsets = [1, 0], sizes = [1, 128], strides = [1, 1]} : vector<4x128xf32> to vector<1x128xf32>
    %77 = vector.broadcast %75 : f32 to vector<1x128xf32>
    %78 = arith.mulf %77, %76 : vector<1x128xf32>
    %79 = arith.addf %74, %78 : vector<1x128xf32>
    %c3_31 = arith.constant 3 : index
    %c2_32 = arith.constant 2 : index
    %80 = memref.load %arg4[%c3_31, %c2_32] : memref<6x4xf32, #tpu.memory_space<smem>>
    %81 = vector.extract_strided_slice %1 {offsets = [2, 0], sizes = [1, 128], strides = [1, 1]} : vector<4x128xf32> to vector<1x128xf32>
    %82 = vector.broadcast %80 : f32 to vector<1x128xf32>
    %83 = arith.mulf %82, %81 : vector<1x128xf32>
    %84 = arith.addf %79, %83 : vector<1x128xf32>
    %c3_33 = arith.constant 3 : index
    %c3_34 = arith.constant 3 : index
    %85 = memref.load %arg4[%c3_33, %c3_34] : memref<6x4xf32, #tpu.memory_space<smem>>
    %86 = vector.extract_strided_slice %1 {offsets = [3, 0], sizes = [1, 128], strides = [1, 1]} : vector<4x128xf32> to vector<1x128xf32>
    %87 = vector.broadcast %85 : f32 to vector<1x128xf32>
    %88 = arith.mulf %87, %86 : vector<1x128xf32>
    %89 = arith.addf %84, %88 : vector<1x128xf32>
    %c4 = arith.constant 4 : index
    %90 = memref.load %arg5[%c4] : memref<6xf32, #tpu.memory_space<smem>>
    %c4_35 = arith.constant 4 : index
    %c0_36 = arith.constant 0 : index
    %91 = memref.load %arg4[%c4_35, %c0_36] : memref<6x4xf32, #tpu.memory_space<smem>>
    %92 = vector.extract_strided_slice %1 {offsets = [0, 0], sizes = [1, 128], strides = [1, 1]} : vector<4x128xf32> to vector<1x128xf32>
    %93 = vector.broadcast %91 : f32 to vector<1x128xf32>
    %94 = arith.mulf %93, %92 : vector<1x128xf32>
    %95 = vector.broadcast %90 : f32 to vector<1x128xf32>
    %96 = arith.addf %95, %94 : vector<1x128xf32>
    %c4_37 = arith.constant 4 : index
    %c1_38 = arith.constant 1 : index
    %97 = memref.load %arg4[%c4_37, %c1_38] : memref<6x4xf32, #tpu.memory_space<smem>>
    %98 = vector.extract_strided_slice %1 {offsets = [1, 0], sizes = [1, 128], strides = [1, 1]} : vector<4x128xf32> to vector<1x128xf32>
    %99 = vector.broadcast %97 : f32 to vector<1x128xf32>
    %100 = arith.mulf %99, %98 : vector<1x128xf32>
    %101 = arith.addf %96, %100 : vector<1x128xf32>
    %c4_39 = arith.constant 4 : index
    %c2_40 = arith.constant 2 : index
    %102 = memref.load %arg4[%c4_39, %c2_40] : memref<6x4xf32, #tpu.memory_space<smem>>
    %103 = vector.extract_strided_slice %1 {offsets = [2, 0], sizes = [1, 128], strides = [1, 1]} : vector<4x128xf32> to vector<1x128xf32>
    %104 = vector.broadcast %102 : f32 to vector<1x128xf32>
    %105 = arith.mulf %104, %103 : vector<1x128xf32>
    %106 = arith.addf %101, %105 : vector<1x128xf32>
    %c4_41 = arith.constant 4 : index
    %c3_42 = arith.constant 3 : index
    %107 = memref.load %arg4[%c4_41, %c3_42] : memref<6x4xf32, #tpu.memory_space<smem>>
    %108 = vector.extract_strided_slice %1 {offsets = [3, 0], sizes = [1, 128], strides = [1, 1]} : vector<4x128xf32> to vector<1x128xf32>
    %109 = vector.broadcast %107 : f32 to vector<1x128xf32>
    %110 = arith.mulf %109, %108 : vector<1x128xf32>
    %111 = arith.addf %106, %110 : vector<1x128xf32>
    %c5 = arith.constant 5 : index
    %112 = memref.load %arg5[%c5] : memref<6xf32, #tpu.memory_space<smem>>
    %c5_43 = arith.constant 5 : index
    %c0_44 = arith.constant 0 : index
    %113 = memref.load %arg4[%c5_43, %c0_44] : memref<6x4xf32, #tpu.memory_space<smem>>
    %114 = vector.extract_strided_slice %1 {offsets = [0, 0], sizes = [1, 128], strides = [1, 1]} : vector<4x128xf32> to vector<1x128xf32>
    %115 = vector.broadcast %113 : f32 to vector<1x128xf32>
    %116 = arith.mulf %115, %114 : vector<1x128xf32>
    %117 = vector.broadcast %112 : f32 to vector<1x128xf32>
    %118 = arith.addf %117, %116 : vector<1x128xf32>
    %c5_45 = arith.constant 5 : index
    %c1_46 = arith.constant 1 : index
    %119 = memref.load %arg4[%c5_45, %c1_46] : memref<6x4xf32, #tpu.memory_space<smem>>
    %120 = vector.extract_strided_slice %1 {offsets = [1, 0], sizes = [1, 128], strides = [1, 1]} : vector<4x128xf32> to vector<1x128xf32>
    %121 = vector.broadcast %119 : f32 to vector<1x128xf32>
    %122 = arith.mulf %121, %120 : vector<1x128xf32>
    %123 = arith.addf %118, %122 : vector<1x128xf32>
    %c5_47 = arith.constant 5 : index
    %c2_48 = arith.constant 2 : index
    %124 = memref.load %arg4[%c5_47, %c2_48] : memref<6x4xf32, #tpu.memory_space<smem>>
    %125 = vector.extract_strided_slice %1 {offsets = [2, 0], sizes = [1, 128], strides = [1, 1]} : vector<4x128xf32> to vector<1x128xf32>
    %126 = vector.broadcast %124 : f32 to vector<1x128xf32>
    %127 = arith.mulf %126, %125 : vector<1x128xf32>
    %128 = arith.addf %123, %127 : vector<1x128xf32>
    %c5_49 = arith.constant 5 : index
    %c3_50 = arith.constant 3 : index
    %129 = memref.load %arg4[%c5_49, %c3_50] : memref<6x4xf32, #tpu.memory_space<smem>>
    %130 = vector.extract_strided_slice %1 {offsets = [3, 0], sizes = [1, 128], strides = [1, 1]} : vector<4x128xf32> to vector<1x128xf32>
    %131 = vector.broadcast %129 : f32 to vector<1x128xf32>
    %132 = arith.mulf %131, %130 : vector<1x128xf32>
    %133 = arith.addf %128, %132 : vector<1x128xf32>
    %c0_51 = arith.constant 0 : index
    %c0_52 = arith.constant 0 : index
    %c0_53 = arith.constant 0 : index
    %134 = vector.load %arg2[%c0_51, %c0_52, %c0_53] : memref<1x4x128xf32, #tpu.memory_space<vmem>>, vector<1x4x128xf32>
    %135 = vector.shape_cast %134 : vector<1x4x128xf32> to vector<4x128xf32>
    %136 = tpu.concatenate %135, %23, %45, %67, %89, %111, %133 in 0 : vector<4x128xf32>, vector<1x128xf32>, vector<1x128xf32>, vector<1x128xf32>, vector<1x128xf32>, vector<1x128xf32>, vector<1x128xf32> -> vector<10x128xf32>
    %c0_54 = arith.constant 0 : index
    %c0_55 = arith.constant 0 : index
    %c0_56 = arith.constant 0 : index
    %137 = vector.load %arg6[%c0_54, %c0_55, %c0_56] : memref<1x10x128xf32, #tpu.memory_space<vmem>>, vector<1x10x128xf32>
    %138 = vector.shape_cast %137 : vector<1x10x128xf32> to vector<10x128xf32>
    %139 = vector.shape_cast %136 : vector<10x128xf32> to vector<1x10x128xf32>
    tpu.vector_store %arg6[%c0_54, %c0_55, %c0_56], %139 {strides = array<i32>} : memref<1x10x128xf32, #tpu.memory_space<vmem>>, vector<1x10x128xf32>,
    return
  }
  func.func @transform_0(%arg0: i32, %arg1: i32) -> (i32, i32, i32) {
    %c0_i32 = arith.constant 0 : i32
    %c0_i32_0 = arith.constant 0 : i32
    return %arg0, %c0_i32, %arg1 : i32, i32, i32
  }
  func.func @transform_1(%arg0: i32, %arg1: i32) -> (i32, i32, i32) {
    %c0_i32 = arith.constant 0 : i32
    %c0_i32_0 = arith.constant 0 : i32
    return %arg0, %c0_i32, %arg1 : i32, i32, i32
  }
  func.func @transform_2(%arg0: i32, %arg1: i32) -> (i32, i32) {
    %c0_i32 = arith.constant 0 : i32
    %c0_i32_0 = arith.constant 0 : i32
    %c0_i32_1 = arith.constant 0 : i32
    return %c0_i32, %c0_i32_0 : i32, i32
  }
  func.func @transform_3(%arg0: i32, %arg1: i32) -> i32 {
    %c0_i32 = arith.constant 0 : i32
    %c0_i32_0 = arith.constant 0 : i32
    return %c0_i32 : i32
  }
  func.func @transform_4(%arg0: i32, %arg1: i32) -> (i32, i32, i32) {
    %c0_i32 = arith.constant 0 : i32
    %c0_i32_0 = arith.constant 0 : i32
    return %arg0, %c0_i32, %arg1 : i32, i32, i32
  }
}

</mosaic_0001>

<bundles_post_ra>
// kernel: tpu_custom_call.1
= control target key start
LH: loop header
LB: loop body
LE: loop exit
PB: predicated region body
PF: predicated region fallthrough
CT: control target
= control target key end

     0   :  { %s1247_s0 = inlined_call_operand.hbm [shape: f32[2,4,256], index: 0, kind: input, shape index: {}]   ;;  %s1248_s1 = inlined_call_operand.hbm [shape: f32[2,4,256], index: 1, kind: input, shape index: {}]   ;;  %s1249_s2 = inlined_call_operand.vmem [shape: f32[6,4], index: 2, kind: input, shape index: {}]   ;;  %s1250_s3 = inlined_call_operand.vmem [shape: f32[6], index: 3, kind: input, shape index: {}]   ;;  %s1251_s4 = inlined_call_operand.vmem [shape: f32[2,10,256], index: 4, kind: output, shape index: {}]  }
   0x1   :  { %1254 = sst [smem:[#allocation17_spill]] %s1249_s2 }
   0x2   :  { %1255 = sst [smem:[#allocation18_spill]] %s1250_s3 }
   0x3   :  { %1256 = sst [smem:[#allocation19_spill]] %s1251_s4 }
   0x4   :  { %9 = vsyncpa [#allocation3], 0 }
   0x5   :  { %11 = vsyncpa [#allocation3 + $0x1], 0 }
   0x6   :  { %12 = vsyncpa [#allocation6], 0 }
   0x7   :  { %14 = vsyncpa [#allocation6 + $0x1], 0 }
   0x8   :  { %15 = vsyncpa [#allocation4], 0 }
   0x9   :  { %16 = vsyncpa [#allocation9], 0  ;;  %s1007_s15 = smov 0   ;;  %s1009_s16 = smov 0  }
   0xa   :  { %s1011_s17 = smov 0   ;;  %s1013_s18 = smov 0  }
   0xb   :  { %s1015_s19 = smov 0   ;;  %s1017_s20 = smov 0  }
   0xc   :  { %s1019_s21 = smov 0   ;;  %s1021_s22 = smov 0  }
   0xd LB: > { %s662_s23 = sadd.s32 4294967295, %s978_s22   ;;  %p56_p0 = scmp.ne.s32.totalorder %s954_s16, %s950_s15  ;;  %s978_s22 = sphi %s1021_s22, %s22_s22   ;;  %s974_s21 = sphi %s1019_s21, %s1276_s21   ;;  %s970_s20 = sphi %s1017_s20, %s1275_s20   ;;  %s966_s19 = sphi %s1015_s19, %s1274_s19   ;;  %s962_s18 = sphi %s1013_s18, %s1273_s18   ;;  %s958_s17 = sphi %s1011_s17, %s1272_s17   ;;  %s954_s16 = sphi %s1009_s16, %s1271_s16   ;;  %s950_s15 = sphi %s1007_s15, %s1270_s15  }
   0xe   : > { %p1047_p1 = scmp.eq.s32.totalorder %s662_s23, 0  ;;  %p1051_p2 = scmp.eq.s32.totalorder %s662_s23, 3 }
   0xf   : > { %p664_p3 = scmp.ge.s32.totalorder %s978_s22, 1  ;;  %p165_p4 = scmp.lt.s32.totalorder %s978_s22, 5 }
  0x10   : > { %p1059_p5 = por %p1047_p1, %p56_p0  ;;  %s1261_s2 = sld [smem:[#allocation17_spill]] }
  0x11   : > { %p1063_p6 = pnand %p664_p3, %p165_p4  ;;  %s1262_s3 = sld [smem:[#allocation18_spill]] }
  0x12   : > { %s980_s8 = smov [#allocation7]   ;;  %s981_s9 = smov [#allocation8]  }
  0x13   : > { %p725_p7 = pneg %p1063_p6  ;;  %s31_s10 = sadd.s32 1, %s970_s20 }
  0x14   : > { %p32_p9 = scmp.ge.s32.totalorder %s31_s10, 2  ;;  %s34_s11 = sadd.s32 1, %s974_s21 }
  0x15   : > { %p726_p8 = pnand %p725_p7, %p1047_p1  ;;  %s43_s12 = sadd.s32 1, %s958_s17 }
  0x16   : > { %s177_s30 = sshll.u32 %s1261_s2, 4  ;;  %p50_p10 = scmp.ne.s32.totalorder %s958_s17, %s954_s16  ;;  %s178_s30 = int_to_ptr.vmem [resolvable:$true] %s177_s30 }
  0x17   : > { %s187_s7 = sshll.u32 %s1262_s3, 4  ;;  %s1278_s10 = smov (%p32_p9, %s31_s10), 0  ;;  %s188_s7 = int_to_ptr.vmem [resolvable:$true] %s187_s7 }
  0x18   : > { %728 = dma.vmem_to_smem (!%p726_p8), %s178_s30, 128, %s980_s8, [#allocation4]  }
  0x19   : > { %731 = dma.vmem_to_smem (!%p726_p8), %s188_s7, 16, %s981_s9, [#allocation9]  }
  0x1a   : > { %1263 = sst [smem:[#allocation15_spill]] %s1278_s10  ;;  %s1280_s11 = smov (!%p32_p9, %s34_s11), %s974_s21 }
  0x1b   : > { %s39_s13 = ssub.s32 %s970_s20, %s1278_s10  ;;  %p51_p11 = scmp.eq.s32.totalorder %s978_s22, 0 }
  0x1c   : > { %p36_p12 = scmp.ge.s32.totalorder %s1280_s11, 2  ;;  %p1090_p13 = por %p1051_p2, %p50_p10 }
  0x1d   : > { %p1094_p0 = por %p51_p11, %p50_p10  ;;  %p741_p3 = scmp.lt.s32.totalorder %s978_s22, 4 }
  0x1e   : > { %s1282_s11 = smov (%p36_p12, %s1280_s11), 0  ;;  %s198_s23 = sand.u32 1, %s958_s17  }
  0x1f   : > { %1266 = sst [smem:[#allocation16_spill]] %s1282_s11  ;;  %s669_s28 = sshll.u32 %s974_s21, 1 }
  0x20   : > { %s38_s29 = ssub.s32 %s974_s21, %s1282_s11  ;;  %s668_s5 = sshll.u32 %s198_s23, 2 }
  0x21   : > { %s40_s30 = sor.u32 %s39_s13, %s38_s29  ;;  %s206_s25 = sadd.s32 %s970_s20, %s669_s28 }
  0x22   : > { %p41_p4 = scmp.eq.s32.totalorder %s40_s30, 0  ;;  %s202_s6 = scalar_lea.vmem [#allocation2], %s668_s5 }
  0x23   : > { %s212_s7 = sshll.u32 %s202_s6, 4  ;;  %s670_s9 = sshll.u32 %s206_s25, 2  ;;  %s213_s7 = int_to_ptr.vmem [resolvable:$true] %s212_s7 }
  0x24   : > { %s1107_s8 = scalar_select %p41_p4, %s958_s17, %s43_s12  }
  0x25   : > { %s208_s10 = scalar_lea.hbm %s1247_s0, %s670_s9  ;;  %p733_p2 = pnand %p741_p3, %p1094_p0 }
  0x26   : > { %s210_s4 = sshll.u32 %s208_s10, 4  ;;  %s199_s11 = scalar_lea.sflag [#allocation3], %s198_s23  ;;  %s211_s4 = int_to_ptr.hbm [resolvable:$true] %s210_s4 }
  0x27   : > { %735 = dma.hbm_to_vmem [thread:$0]  (!%p733_p2), %s211_s4, 64, %s213_s7, %s199_s11  }
  0x28   : > { %s229_s28 = scalar_lea.hbm %s1248_s1, %s670_s9  ;;  %s223_s12 = scalar_lea.vmem [#allocation5], %s668_s5 }
  0x29   : > { %s231_s30 = sshll.u32 %s229_s28, 4  ;;  %s233_s6 = sshll.u32 %s223_s12, 4  ;;  %s232_s30 = int_to_ptr.hbm [resolvable:$true] %s231_s30  ;;  %s234_s6 = int_to_ptr.vmem [resolvable:$true] %s233_s6 }
  0x2a   : > { %s220_s25 = scalar_lea.sflag [#allocation6], %s198_s23  ;;  %242 = sbr.rel (%p1063_p6) target bundleno = 112 (0x70), region = 36 }
  0x2b   : > { %738 = dma.hbm_to_vmem [thread:$0]  (!%p733_p2), %s232_s30, 64, %s234_s6, %s220_s25  }
  0x2c   : > { %s1122_s2 = sand.u32 (!%p1063_p6), 1, %s954_s16  }
  0x2d   : > { %s675_s3 = sshll.u32 (!%p1063_p6), %s1122_s2, 2  ;;  %s245_s4 = scalar_lea.sflag (!%p1063_p6), [#allocation3], %s1122_s2 }
  0x2e   : > { %s1126_s10 = scalar_lea.vmem (!%p1063_p6), [#allocation2], %s675_s3 }
  0x2f   : > { %933 = dma.done.wait (%p1059_p5), %s245_s4, 64  }
  0x30   : > { %935 = vsyncadd (%p1059_p5), %s245_s4, 4294967232  ;;  %s255_s11 = scalar_lea.sflag [#allocation6], %s1122_s2  ;;  %s258_s27 = scalar_lea.vmem [#allocation5], %s675_s3 }
  0x31   : > { %937 = dma.done.wait (%p1059_p5), %s255_s11, 64  }
  0x32   : > { %939 = vsyncadd (%p1059_p5), %s255_s11, 4294967232 }
  0x33   : > { %941 = dma.done.wait (%p1047_p1), [#allocation4], 128  }
  0x34   : > { %943 = vsyncadd (%p1047_p1), [#allocation4], 4294967168 }
  0x35   : > { %945 = dma.done.wait (%p1047_p1), [#allocation9], 16  }
  0x36   : > { %947 = vsyncadd (%p1047_p1), [#allocation9], 4294967280 }
  0x37   : > { %274 = sfence }
  0x38   : > { %s300_s15 = sld [smem:[#allocation8]]  ;;  %v1145_v0 = vld [vmem:[%s258_s27] sm:$0xf]  ;;  %vm478_vm0 = vcmask 1043456   ;;  %v462_v52 = vld [vmem:[%s1126_s10] sm:$0xf] }
  0x39   : > { %s301_s23 = sld [smem:[#allocation7]]  ;;  %vm480_vm1 = vcmask 1044480   ;;  %vm482_vm2 = vcmask 1045504   ;;  %vm484_vm3 = vcmask 1046528   ;;  %vm486_vm4 = vcmask 1040384  }
  0x3a   : > { %s680_s5 = sld [smem:[#allocation7 + $0x1]] }
  0x3b   : > { %s681_s7 = sld [smem:[#allocation7 + $0x2]] }
  0x3c   : > { %s682_s9 = sld [smem:[#allocation7 + $0x3]] }
  0x3d   : > { %s1147_s26 = sld [smem:[#allocation8 + $0x1]] }
  0x3e   : > { %s684_s13 = sld [smem:[#allocation7 + $0x80]]  ;;  %v304_v2 = vstv %s300_s15 }
  0x3f   : > { %v302_v1 = vstv %s301_s23  ;;  %s685_s29 = sld [smem:[#allocation7 + $0x81]] }
  0x40   : > { %v303_v3 = vmul.f32 %v302_v1, %v1145_v0  ;;  %v307_v4 = vstv %s680_s5  ;;  %s686_s24 = sld [smem:[#allocation7 + $0x82]] }
  0x41   : > { %v308_v5 = vmul.f32 %v307_v4, %v1145_v0  ;;  %v314_v6 = vstv %s681_s7  ;;  %s687_s28 = sld [smem:[#allocation7 + $0x83]] }
  0x42   : > { %v305_v7 = vadd.f32 %v304_v2, %v303_v3  ;;  %v315_v8 = vmul.f32 %v314_v6, %v1145_v0  ;;  %v321_v9 = vstv %s682_s9  ;;  %s1152_s30 = sld [smem:[#allocation8 + $0x2]] }
  0x43   : > { %v310_v10 = vrot.slane %v308_v5, 1  ;;  %v322_v11 = vmul.f32 %v321_v9, %v1145_v0  ;;  %s689_s12 = sld [smem:[#allocation7 + $0x100]]  ;;  %v331_v14 = vstv %s1147_s26 }
  0x44   : > { %v317_v12 = vrot.slane %v315_v8, 2  ;;  %v329_v13 = vstv %s684_s13  ;;  %s690_s6 = sld [smem:[#allocation7 + $0x101]] }
  0x45   : > { %v312_v15 = vadd.f32 %v310_v10, %v305_v7  ;;  %v324_v16 = vrot.slane %v322_v11, 3  ;;  %v330_v17 = vmul.f32 %v329_v13, %v1145_v0  ;;  %v334_v18 = vstv %s685_s29  ;;  %s691_s25 = sld [smem:[#allocation7 + $0x102]] }
  0x46   : > { %v335_v19 = vmul.f32 %v334_v18, %v1145_v0  ;;  %v341_v20 = vstv %s686_s24  ;;  %s692_s3 = sld [smem:[#allocation7 + $0x103]] }
  0x47   : > { %v319_v21 = vadd.f32 %v317_v12, %v312_v15  ;;  %v332_v22 = vadd.f32 %v331_v14, %v330_v17  ;;  %v342_v23 = vmul.f32 %v341_v20, %v1145_v0  ;;  %v348_v24 = vstv %s687_s28  ;;  %s1159_s4 = sld [smem:[#allocation8 + $0x3]] }
  0x48   : > { %v337_v25 = vrot.slane %v335_v19, 1  ;;  %v349_v26 = vmul.f32 %v348_v24, %v1145_v0  ;;  %s1162_s11 = sld [smem:[#allocation7 + $0x180]]  ;;  %v358_v30 = vstv %s1152_s30 }
  0x49   : > { %v326_v27 = vadd.f32 %v324_v16, %v319_v21  ;;  %v344_v28 = vrot.slane %v342_v23, 2  ;;  %v356_v29 = vstv %s689_s12  ;;  %s1165_s27 = sld [smem:[#allocation7 + $0x181]]  ;;  %s679_s12 = sshll.u32 %s1122_s2, 4 }
  0x4a   : > { %v339_v31 = vadd.f32 %v337_v25, %v332_v22  ;;  %v351_v32 = vrot.slane %v349_v26, 3  ;;  %v357_v33 = vmul.f32 %v356_v29, %v1145_v0  ;;  %v361_v34 = vstv %s690_s6  ;;  %s1168_s15 = sld [smem:[#allocation7 + $0x182]]  ;;  %s298_s2 = scalar_lea.vmem [#allocation10], %s679_s12 }
  0x4b   : > { %v362_v35 = vmul.f32 %v361_v34, %v1145_v0  ;;  %v368_v36 = vstv %s691_s25  ;;  %s1171_s23 = sld [smem:[#allocation7 + $0x183]]  ;;  %v464_v43 = vrot.slane %v326_v27, 4  ;;  %s709_s6 = sshll.u32 (%p1090_p13), %s966_s19, 2 }
  0x4c   : > { %v346_v37 = vadd.f32 %v344_v28, %v339_v31  ;;  %v359_v38 = vadd.f32 %v358_v30, %v357_v33  ;;  %v369_v39 = vmul.f32 %v368_v36, %v1145_v0  ;;  %v375_v40 = vstv %s692_s3  ;;  %s1174_s5 = sld [smem:[#allocation8 + $0x4]]  ;;  %s498_s25 = sadd.s32 (%p1090_p13), %s962_s18, %s709_s6 }
  0x4d   : > { %v364_v41 = vrot.slane %v362_v35, 1  ;;  %v376_v42 = vmul.f32 %v375_v40, %v1145_v0  ;;  %s1177_s7 = sld [smem:[#allocation7 + $0x200]]  ;;  %v385_v47 = vstv %s1159_s4  ;;  %v479_v62 = vsel %vm478_vm0, %v462_v52, %v464_v43  ;;  %s710_s3 = sshll.u32 (%p1090_p13), %s498_s25, 3 }
  0x4e   : > { %v353_v44 = vadd.f32 %v351_v32, %v346_v37  ;;  %v371_v45 = vrot.slane %v369_v39, 2  ;;  %v383_v46 = vstv %s1162_s11  ;;  %s1181_s9 = sld [smem:[#allocation7 + $0x201]] }
  0x4f   : > { %v366_v48 = vadd.f32 %v364_v41, %v359_v38  ;;  %v378_v49 = vrot.slane %v376_v42, 3  ;;  %v384_v50 = vmul.f32 %v383_v46, %v1145_v0  ;;  %v388_v51 = vstv %s1165_s27  ;;  %s1185_s26 = sld [smem:[#allocation7 + $0x202]] }
  0x50   : > { %v389_v53 = vmul.f32 %v388_v51, %v1145_v0  ;;  %v395_v54 = vstv %s1168_s15  ;;  %s1190_s13 = sld [smem:[#allocation7 + $0x203]]  ;;  %v467_v55 = vrot.slane %v353_v44, 3 }
  0x51   : > { %v373_v56 = vadd.f32 %v371_v45, %v366_v48  ;;  %v386_v57 = vadd.f32 %v385_v47, %v384_v50  ;;  %v396_v58 = vmul.f32 %v395_v54, %v1145_v0  ;;  %v402_v59 = vstv %s1171_s23  ;;  %s1194_s29 = sld [smem:[#allocation8 + $0x5]] }
  0x52   : > { %v391_v60 = vrot.slane %v389_v53, 1  ;;  %v403_v61 = vmul.f32 %v402_v59, %v1145_v0  ;;  %s704_s10 = sld [smem:[#allocation7 + $0x280]]  ;;  %v412_v3 = vstv %s1174_s5  ;;  %v481_v11 = vsel %vm480_vm1, %v479_v62, %v467_v55 }
  0x53   : > { %v380_v63 = vadd.f32 %v378_v49, %v373_v56  ;;  %v398_v1 = vrot.slane %v396_v58, 2  ;;  %v410_v2 = vstv %s1177_s7  ;;  %s705_s24 = sld [smem:[#allocation7 + $0x281]] }
  0x54   : > { %v393_v4 = vadd.f32 %v391_v60, %v386_v57  ;;  %v405_v5 = vrot.slane %v403_v61, 3  ;;  %v411_v6 = vmul.f32 %v410_v2, %v1145_v0  ;;  %v415_v7 = vstv %s1181_s9  ;;  %s706_s28 = sld [smem:[#allocation7 + $0x282]] }
  0x55   : > { %v416_v8 = vmul.f32 %v415_v7, %v1145_v0  ;;  %v422_v9 = vstv %s1185_s26  ;;  %s707_s30 = sld [smem:[#allocation7 + $0x283]]  ;;  %v470_v10 = vrot.slane %v380_v63, 2 }
  0x56   : > { %v400_v12 = vadd.f32 %v398_v1, %v393_v4  ;;  %v413_v13 = vadd.f32 %v412_v3, %v411_v6  ;;  %v423_v14 = vmul.f32 %v422_v9, %v1145_v0  ;;  %v429_v15 = vstv %s1190_s13  ;;  %s1267_s27 = sld [smem:[#allocation19_spill]] (%p1090_p13) }
  0x57   : > { %v418_v16 = vrot.slane %v416_v8, 1  ;;  %v430_v18 = vmul.f32 %v429_v15, %v1145_v0  ;;  %v439_v20 = vstv %s1194_s29  ;;  %v483_v24 = vsel %vm482_vm2, %v481_v11, %v470_v10 }
  0x58   : > { %v407_v17 = vadd.f32 %v405_v5, %v400_v12  ;;  %v437_v19 = vstv %s704_s10  ;;  %v425_v21 = vrot.slane %v423_v14, 2 }
  0x59   : > { %v438_v22 = vmul.f32 %v437_v19, %v1145_v0  ;;  %v442_v23 = vstv %s705_s24  ;;  %v420_v25 = vadd.f32 %v418_v16, %v413_v13  ;;  %v432_v37 = vrot.slane %v430_v18, 3 }
  0x5a   : > { %v443_v26 = vmul.f32 %v442_v23, %v1145_v0  ;;  %v449_v27 = vstv %s706_s28  ;;  %v473_v28 = vrot.slane %v407_v17, 1 }
  0x5b   : > { %v440_v29 = vadd.f32 %v439_v20, %v438_v22  ;;  %v450_v30 = vmul.f32 %v449_v27, %v1145_v0  ;;  %v456_v31 = vstv %s707_s30  ;;  %v427_v36 = vadd.f32 %v425_v21, %v420_v25 }
  0x5c   : > { %v445_v32 = vrot.slane %v443_v26, 1  ;;  %v457_v33 = vmul.f32 %v456_v31, %v1145_v0  ;;  %v485_v34 = vsel %vm484_vm3, %v483_v24, %v473_v28  ;;  %s500_s15 = scalar_lea.vmem (%p1090_p13), %s1267_s27, %s710_s3 }
  0x5d   : > { %v452_v35 = vrot.slane %v450_v30, 2  ;;  %488 = vst [vmem:[%s298_s2] sm:$0xff] %v485_v34  ;;  %v434_v41 = vadd.f32 %v432_v37, %v427_v36 }
  0x5e   : > { %v447_v38 = vadd.f32 %v445_v32, %v440_v29  ;;  %v459_v39 = vrot.slane %v457_v33, 3 }
  0x60   : > { %v454_v40 = vadd.f32 %v452_v35, %v447_v38 }
  0x62   : > { %v461_v42 = vadd.f32 %v459_v39, %v454_v40 }
  0x63   : > { %496 = sbr.rel (!%p1090_p13) target bundleno = 112 (0x70), region = 56 }
  0x64   : > { %v476_v43 = vrot.slane %v461_v42, 7  ;;  %v531_v0 = vld [vmem:[%s298_s2] sm:$0xff] (%p1090_p13) }
  0x65   : > { %532 = vst [vmem:[%s500_s15] sm:$0xff] (%p1090_p13), %v531_v0 }
  0x66   : > { %v487_v44 = vsel %vm486_vm4, %v434_v41, %v476_v43 }
  0x67   : > { %489 = vst [vmem:[%s298_s2 + $0x8] sm:$0x3] %v487_v44 }
  0x6e   : > { %v533_v45 = vld [vmem:[%s298_s2 + $0x8] sm:$0xff] }
  0x6f   : > { %534 = vst [vmem:[%s500_s15 + $0x10] sm:$0xff] %v533_v45 }
  0x70 PF: > { %s22_s22 = sadd.s32 1, %s978_s22   ;;  %s1268_s14 = sld [smem:[#allocation15_spill]] }
  0x71   : > { %p19_p1 = scmp.ge.s32.totalorder %s22_s22, 6   ;;  %s1269_s23 = sld [smem:[#allocation16_spill]] }
  0x72   : > { %s1270_s15 = smov %s954_s16  ;;  %s1271_s16 = smov %s958_s17 }
  0x73   : > { %s1272_s17 = smov %s1107_s8  ;;  %s1273_s18 = smov %s970_s20 }
  0x74   : > { %s1274_s19 = smov %s974_s21  ;;  %21 = sbr.rel (!%p19_p1) target bundleno = 13 (0xd), region = 136 }
  0x76   : > { %s1275_s20 = smov %s1268_s14 }
  0x77   : > { %s1276_s21 = smov %s1269_s23 }
  0x79   :  { %550 = vsyncpa [#allocation3], 1 }
  0x7a   :  { %552 = vsyncpa [#allocation3 + $0x1], 1 }
  0x7b   :  { %553 = vsyncpa [#allocation6], 1 }
  0x7c   :  { %555 = vsyncpa [#allocation6 + $0x1], 1 }
  0x7d   :  { %556 = vsyncpa [#allocation4], 1 }
  0x7e   :  { %558 = vsyncpa [#allocation4 + $0x1], 1 }
  0x7f   :  { %559 = vsyncpa [#allocation9], 1 }

</bundles_post_ra>
